<compile_context>
chip_gen: v7x
topology: tpu7x:2x2x1
jax: 0.10.0
libtpu: 0.0.40
codegen_flags: <defaults>
</compile_context>

<pallas_src>
from functools import partial

import jax
import jax.numpy as jnp
from jax import lax
from jax.experimental import pallas as pl
from jax.experimental.pallas import tpu as pltpu

# Small compat shim (older jax spells it TPUCompilerParams).
_CompilerParams = getattr(pltpu, "CompilerParams",
                          getattr(pltpu, "TPUCompilerParams", None))


def _chan_ln_kernel(x_ref, g_ref, o_ref, *, eps, stable):
    # x_ref: (NB, C, TS) tile; g_ref: (1, C, 1); o_ref: (NB, C, TS).
    # The channel reduction runs over axis=-2 (sublane side); lanes stay dense.
    x = x_ref[...].astype(jnp.float32)
    if stable:
        # x / x.amax(dim=channel, keepdim=True)  (detach is a no-op in fwd)
        x = x / jnp.max(x, axis=-2, keepdims=True)
    mean = jnp.mean(x, axis=-2, keepdims=True)         # (NB, 1, TS)
    xc = x - mean
    # torch.var(..., unbiased=False) == mean of squared deviations
    var = jnp.mean(xc * xc, axis=-2, keepdims=True)    # (NB, 1, TS)
    inv = lax.rsqrt(var + eps)
    g = g_ref[...].astype(jnp.float32)                 # (1, C, 1) broadcast
    o_ref[...] = (xc * inv * g).astype(o_ref.dtype)


def _vmem_budget():
    """(f32 working-block budget bytes, vmem_limit_bytes), generation-aware."""
    try:
        vmem_bytes = pltpu.get_tpu_info().vmem_capacity_bytes
    except Exception:
        vmem_bytes = 64 << 20  # assume the smallest (v7x-like) if unknown
    if vmem_bytes >= (100 << 20):      # v5e / v6e: 128 MiB physical VMEM
        return 10 << 20, 96 << 20
    return 4 << 20, 48 << 20           # v7x: 64 MiB physical VMEM


def _pick_tiles(N, C, S):
    """Pick (NB, TS, vmem_limit): bytes-per-step sized blocks, batch folded in
    when C is small, spatial tile a multiple of 128 (or the full S)."""
    block_budget_bytes, vmem_limit = _vmem_budget()
    budget_elems = max(block_budget_bytes // 4, 128 * max(C, 1))

    # Largest lane tile (multiple of 128) that keeps the f32 block in budget;
    # if S fits entirely, take the full spatial extent (valid even if S%128!=0).
    max_ts = max(128, ((budget_elems // max(C, 1)) // 128) * 128)
    ts = S if S <= max_ts else max_ts

    # Fold batch elements into the block while staying inside the budget.
    nb = max(1, min(N, budget_elems // max(C * ts, 1)))

    # v7x megacore: keep >= 4 grid steps when each step would still move
    # >= ~1 MiB after splitting; tiny tensors stay as a single step.
    def steps(nb_, ts_):
        return pl.cdiv(N, nb_) * pl.cdiv(S, ts_)

    while steps(nb, ts) < 4 and (nb * C * ts * 4) >= (2 << 20):
        if nb > 1:
            nb = (nb + 1) // 2
        else:
            new_ts = max(128, ((ts // 2 + 127) // 128) * 128)
            if new_ts >= ts:
                break
            ts = new_ts

    return nb, ts, vmem_limit


def chan_layer_norm(x, g, *, eps=1e-5, fp16_eps=1e-3, stable=False):
    """x: (N, C, H, W) NCHW, g: (1, C, 1, 1). Returns (N, C, H, W)."""
    N, C, H, W = x.shape
    e = eps if x.dtype == jnp.float32 else fp16_eps

    S = H * W
    x3 = x.reshape(N, C, S)          # free: contiguous reshape, no transpose
    g3 = g.reshape(1, C, 1)

    NB, TS, vmem_limit = _pick_tiles(N, C, S)
    grid = (pl.cdiv(N, NB), pl.cdiv(S, TS))

    out3 = pl.pallas_call(
        partial(_chan_ln_kernel, eps=e, stable=stable),
        out_shape=jax.ShapeDtypeStruct((N, C, S), x.dtype),
        grid_spec=pltpu.PrefetchScalarGridSpec(
            num_scalar_prefetch=0,
            grid=grid,
            in_specs=[
                pl.BlockSpec((NB, C, TS), lambda n, s: (n, 0, s)),  # activations
                pl.BlockSpec((1, C, 1), lambda n, s: (0, 0, 0)),    # gain (tiny)
            ],
            out_specs=pl.BlockSpec((NB, C, TS), lambda n, s: (n, 0, s)),
        ),
        compiler_params=_CompilerParams(
            dimension_semantics=("parallel", "parallel"),
            vmem_limit_bytes=vmem_limit,
        ),
    )(x3, g3)

    return out3.reshape(N, C, H, W)


def _reference(x, g, *, eps=1e-5, fp16_eps=1e-3, stable=False):
    e = eps if x.dtype == jnp.float32 else fp16_eps
    xf = x.astype(jnp.float32)
    if stable:
        xf = xf / jnp.max(xf, axis=1, keepdims=True)
    mean = jnp.mean(xf, axis=1, keepdims=True)
    var = jnp.mean((xf - mean) ** 2, axis=1, keepdims=True)
    return ((xf - mean) * lax.rsqrt(var + e) * g.astype(jnp.float32)).astype(x.dtype)


if __name__ == "__main__":
    key = jax.random.PRNGKey(0)
    N, C, H, W = 2, 4, 16, 16
    x = jax.random.normal(key, (N, C, H, W), dtype=jnp.float32)
    # Parameter init matches nn.Parameter(torch.ones(1, dim, 1, 1))
    g = jnp.ones((1, C, 1, 1), dtype=jnp.float32)

    y = jax.block_until_ready(chan_layer_norm(x, g, stable=False))
    y_ref = _reference(x, g, stable=False)
    assert y.shape == (N, C, H, W)
    assert jnp.allclose(y, y_ref, atol=1e-5, rtol=1e-5)

    # Odd spatial extent (H*W not a multiple of 128, no padding anywhere) plus
    # the stable=True path on well-conditioned positive inputs.
    k2 = jax.random.PRNGKey(0)
    x2 = jax.random.uniform(k2, (2, 4, 6, 7), dtype=jnp.float32,
                            minval=0.5, maxval=1.5)
    y2 = jax.block_until_ready(chan_layer_norm(x2, g, stable=True))
    y2_ref = _reference(x2, g, stable=True)
    assert jnp.allclose(y2, y2_ref, atol=1e-5, rtol=1e-5)

    print("KERNEL_OK")
</pallas_src>

<mosaic_0001>
module attributes {stable_mosaic.version = 11 : i64} {
  func.func @_chan_ln_kernel(%arg0: i32, %arg1: i32, %arg2: memref<2x4x256xf32, #tpu.memory_space<vmem>>, %arg3: memref<1x4x1xf32, #tpu.memory_space<vmem>>, %arg4: memref<2x4x256xf32, #tpu.memory_space<vmem>>) attributes {dimension_semantics = [#tpu.dimension_semantics<parallel>, #tpu.dimension_semantics<parallel>], iteration_bounds = array<i64: 1, 1>, scalar_prefetch = 0 : i64, scratch_operands = 0 : i64, tpu.core_type = #tpu.core_type<tc>, window_params = [{transform_indices = @transform_0, window_bounds = array<i64: 2, 4, 256>}, {pipeline_mode = #tpu.pipeline_mode<synchronous>, transform_indices = @transform_1, window_bounds = array<i64: 1, 4, 1>}, {transform_indices = @transform_2, window_bounds = array<i64: 2, 4, 256>}]} {
    %c0 = arith.constant 0 : index
    %c0_0 = arith.constant 0 : index
    %c0_1 = arith.constant 0 : index
    %0 = vector.load %arg2[%c0, %c0_0, %c0_1] : memref<2x4x256xf32, #tpu.memory_space<vmem>>, vector<2x4x256xf32>
    %cst = arith.constant dense<0.000000e+00> : vector<2x256xf32>
    %1 = vector.multi_reduction <add>, %0, %cst [1] : vector<2x4x256xf32> to vector<2x256xf32>
    %2 = vector.shape_cast %1 : vector<2x256xf32> to vector<2x1x256xf32>
    %cst_2 = arith.constant 4.000000e+00 : f32
    %3 = vector.broadcast %cst_2 : f32 to vector<2x1x256xf32>
    %4 = arith.divf %2, %3 : vector<2x1x256xf32>
    %5 = vector.broadcast %4 : vector<2x1x256xf32> to vector<2x4x256xf32>
    %6 = arith.subf %0, %5 : vector<2x4x256xf32>
    %7 = arith.mulf %6, %6 : vector<2x4x256xf32>
    %cst_3 = arith.constant dense<0.000000e+00> : vector<2x256xf32>
    %8 = vector.multi_reduction <add>, %7, %cst_3 [1] : vector<2x4x256xf32> to vector<2x256xf32>
    %9 = vector.shape_cast %8 : vector<2x256xf32> to vector<2x1x256xf32>
    %cst_4 = arith.constant 4.000000e+00 : f32
    %10 = vector.broadcast %cst_4 : f32 to vector<2x1x256xf32>
    %11 = arith.divf %9, %10 : vector<2x1x256xf32>
    %cst_5 = arith.constant 9.99999974E-6 : f32
    %12 = vector.broadcast %cst_5 : f32 to vector<2x1x256xf32>
    %13 = arith.addf %11, %12 : vector<2x1x256xf32>
    %14 = math.rsqrt %13 : vector<2x1x256xf32>
    %c0_6 = arith.constant 0 : index
    %c0_7 = arith.constant 0 : index
    %c0_8 = arith.constant 0 : index
    %15 = vector.load %arg3[%c0_6, %c0_7, %c0_8] : memref<1x4x1xf32, #tpu.memory_space<vmem>>, vector<1x4x1xf32>
    %16 = vector.broadcast %14 : vector<2x1x256xf32> to vector<2x4x256xf32>
    %17 = arith.mulf %6, %16 : vector<2x4x256xf32>
    %18 = vector.broadcast %15 : vector<1x4x1xf32> to vector<2x4x256xf32>
    %19 = arith.mulf %17, %18 : vector<2x4x256xf32>
    %c0_9 = arith.constant 0 : index
    %c0_10 = arith.constant 0 : index
    %c0_11 = arith.constant 0 : index
    %20 = vector.load %arg4[%c0_9, %c0_10, %c0_11] : memref<2x4x256xf32, #tpu.memory_space<vmem>>, vector<2x4x256xf32>
    tpu.vector_store %arg4[%c0_9, %c0_10, %c0_11], %19 {strides = array<i32>} : memref<2x4x256xf32, #tpu.memory_space<vmem>>, vector<2x4x256xf32>,
    return
  }
  func.func @transform_0(%arg0: i32, %arg1: i32) -> (i32, i32, i32) {
    %c0_i32 = arith.constant 0 : i32
    %c0_i32_0 = arith.constant 0 : i32
    return %arg0, %c0_i32, %arg1 : i32, i32, i32
  }
  func.func @transform_1(%arg0: i32, %arg1: i32) -> (i32, i32, i32) {
    %c0_i32 = arith.constant 0 : i32
    %c0_i32_0 = arith.constant 0 : i32
    %c0_i32_1 = arith.constant 0 : i32
    %c0_i32_2 = arith.constant 0 : i32
    return %c0_i32, %c0_i32_0, %c0_i32_1 : i32, i32, i32
  }
  func.func @transform_2(%arg0: i32, %arg1: i32) -> (i32, i32, i32) {
    %c0_i32 = arith.constant 0 : i32
    %c0_i32_0 = arith.constant 0 : i32
    return %arg0, %c0_i32, %arg1 : i32, i32, i32
  }
}

</mosaic_0001>

<bundles_post_ra>
// kernel: tpu_custom_call.1
= control target key start
LH: loop header
LB: loop body
LE: loop exit
PB: predicated region body
PF: predicated region fallthrough
CT: control target
= control target key end

     0   :  { %7 = vsyncpa [#allocation3], 0  ;;  %s297_s0 = inlined_call_operand.hbm [shape: f32[2,4,256], index: 0, kind: input, shape index: {}]   ;;  %s298_s1 = inlined_call_operand.vmem [shape: f32[1,4,1], index: 1, kind: input, shape index: {}]   ;;  %s299_s2 = inlined_call_operand.hbm [shape: f32[2,4,256], index: 2, kind: output, shape index: {}]  }
   0x1   :  { %8 = vsyncpa [#allocation4], 0  ;;  %s235_s9 = smov [#allocation2]   ;;  %s187_s13 = scalar_lea.hbm %s297_s0, 256 }
   0x2   :  { %s14_s10 = sshll.u32 %s235_s9, 4  ;;  %p188_p0 = scmp.ne.s32.totalorder %s297_s0, %s187_s13  ;;  %s15_s10 = int_to_ptr.vmem [resolvable:$true] %s14_s10 }
   0x3   :  { %p191_p1 = scmp.lt.u32.totalorder %s187_s13, %s297_s0 }
   0x5   :  { %p193_p2 = pnand %p191_p1, %p188_p0 }
   0x7   :  { %196 = shalt.err (!%p193_p2)
}
   0x8   :  { %s197_s18 = scalar_lea.vmem %s15_s10, 256  ;;  %p202_p4 = scmp.lt.s32.totalorder %s15_s10, %s15_s10 }
   0x9   :  { %p198_p3 = scmp.ne.s32.totalorder %s15_s10, %s197_s18  ;;  %p203_p5 = scmp.lt.s32.totalorder %s197_s18, %s197_s18 }
   0xb   :  { %p204_p6 = por %p203_p5, %p202_p4 }
   0xd   :  { %p205_p7 = pnand %p204_p6, %p198_p3 }
   0xf   :  { %208 = shalt.err (!%p205_p7)
}
  0x10   :  { %s236_s19 = smov 128   ;;  %s237_s20 = smov 8  }
  0x11   :  { %20 = dma.hbm_to_vmem [thread:$0]  %s297_s0, 256, %s15_s10, [#allocation3], %s236_s19, %s236_s19, %s237_s20  }
  0x12   :  { %231 = dma.done.wait [#allocation3], 256  }
  0x13   :  { %232 = vsyncadd [#allocation3], 4294967040  ;;  %v238_v0 = vmov 0   ;;  %v126_v1 = vld [vmem:[%s298_s1] sm:$0xf]  ;;  %v27_v3 = vld [vmem:[#allocation2 + $0x8] sm:$0xff] }
  0x14   :  { %176 = vset.pattern.permute.xlu0 %v238_v0  ;;  %v26_v2 = vld [vmem:[#allocation2] sm:$0xff]  ;;  %vm34_vm0 = vcmask 1043456   ;;  %v31_v5 = vcombine.high %v27_v3, %v27_v3  ;;  %s240_s0 = smov [#allocation5]  }
  0x15   :  { %139 = vperm.xlu0 %176, %v126_v1   ;;  %v30_v4 = vcombine.high %v26_v2, %v26_v2  ;;  %v35_v6 = vsel %vm34_vm0, %v26_v2, 0.0  ;;  %v49_v8 = vsel %vm34_vm0, %v27_v3, 0.0  ;;  %s158_s1 = sshll.u32 %s240_s0, 4  ;;  %s159_s1 = int_to_ptr.vmem [resolvable:$true] %s158_s1 }
  0x16   :  { %v56_v9 = vsel %vm34_vm0, %v31_v5, 0.0  ;;  %v36_v10 = vrot.slane %v35_v6, 4  ;;  %v50_v12 = vrot.slane %v49_v8, 4  ;;  %s209_s25 = scalar_lea.vmem %s159_s1, 256  ;;  %p214_p9 = scmp.lt.s32.totalorder %s159_s1, %s159_s1 }
  0x17   :  { %v42_v7 = vsel %vm34_vm0, %v30_v4, 0.0  ;;  %v57_v13 = vrot.slane %v56_v9, 4  ;;  %p210_p8 = scmp.ne.s32.totalorder %s159_s1, %s209_s25  ;;  %p215_p10 = scmp.lt.s32.totalorder %s209_s25, %s209_s25 }
  0x18   :  { %v43_v11 = vrot.slane %v42_v7, 4  ;;  %v37_v14 = vadd.f32 %v36_v10, %v35_v6  ;;  %v51_v16 = vadd.f32 %v50_v12, %v49_v8 }
  0x19   :  { %v58_v17 = vadd.f32 %v57_v13, %v56_v9  ;;  %p216_p11 = por %p215_p10, %p214_p9 }
  0x1a   :  { %v44_v15 = vadd.f32 %v43_v11, %v42_v7  ;;  %v38_v18 = vrot.slane %v37_v14, 2  ;;  %v52_v20 = vrot.slane %v51_v16, 2 }
  0x1b   :  { %v59_v21 = vrot.slane %v58_v17, 2  ;;  %p217_p12 = pnand %p216_p11, %p210_p8 }
  0x1c   :  { %v45_v19 = vrot.slane %v44_v15, 2  ;;  %v39_v22 = vadd.f32 %v38_v18, %v37_v14  ;;  %v53_v24 = vadd.f32 %v52_v20, %v51_v16 }
  0x1d   :  { %v60_v25 = vadd.f32 %v59_v21, %v58_v17  ;;  %v144_v21 = vlaneseq }
  0x1e   :  { %v46_v23 = vadd.f32 %v45_v19, %v44_v15  ;;  %v40_v26 = vrot.slane %v39_v22, 1  ;;  %v54_v28 = vrot.slane %v53_v24, 1  ;;  %v239_v19 = vmov 839922192  }
  0x1f   :  { %v61_v29 = vrot.slane %v60_v25, 1  ;;  %v142_v20 = vunpack.c.l.s4 %v239_v19 }
  0x20   :  { %v47_v27 = vrot.slane %v46_v23, 1  ;;  %v41_v30 = vadd.f32 %v40_v26, %v39_v22  ;;  %v55_v32 = vadd.f32 %v54_v28, %v53_v24  ;;  %v145_v26 = vshrl.u32 %v144_v21, 7 }
  0x21   :  { %v62_v33 = vadd.f32 %v61_v29, %v60_v25  ;;  %v143_v25 = vunpack.c.0.s8 %v142_v20 }
  0x22   :  { %v48_v31 = vadd.f32 %v47_v27, %v46_v23  ;;  %v64_v34 = vmul.f32 0.25, %v41_v30  ;;  %v66_v36 = vmul.f32 0.25, %v55_v32 }
  0x23   :  { %v67_v37 = vmul.f32 0.25, %v62_v33  ;;  %v146_v29 = vsub.s32 %v143_v25, %v145_v26 }
  0x24   :  { %v65_v35 = vmul.f32 0.25, %v48_v31 }
  0x25   :  { %v73_v39 = vcombine.low %v66_v36, %v67_v37 }
  0x26   :  { %v72_v38 = vcombine.low %v64_v34, %v65_v35 }
  0x27   :  { %v77_v41 = vsub.f32 %v27_v3, %v73_v39 }
  0x28   :  { %v76_v40 = vsub.f32 %v26_v2, %v72_v38 }
  0x29   :  { %v79_v43 = vmul.f32 %v77_v41, %v77_v41 }
  0x2a   :  { %v78_v42 = vmul.f32 %v76_v40, %v76_v40 }
  0x2b   :  { %v83_v45 = vcombine.high %v79_v43, %v79_v43  ;;  %v100_v47 = vsel %vm34_vm0, %v79_v43, 0.0 }
  0x2c   :  { %v82_v44 = vcombine.high %v78_v42, %v78_v42  ;;  %v86_v46 = vsel %vm34_vm0, %v78_v42, 0.0  ;;  %v101_v51 = vrot.slane %v100_v47, 4 }
  0x2d   :  { %v87_v49 = vrot.slane %v86_v46, 4  ;;  %v107_v50 = vsel %vm34_vm0, %v83_v45, 0.0 }
  0x2e   :  { %v93_v48 = vsel %vm34_vm0, %v82_v44, 0.0  ;;  %v108_v53 = vrot.slane %v107_v50, 4  ;;  %v102_v55 = vadd.f32 %v101_v51, %v100_v47 }
  0x2f   :  { %v94_v52 = vrot.slane %v93_v48, 4  ;;  %v88_v54 = vadd.f32 %v87_v49, %v86_v46 }
  0x30   :  { %v109_v57 = vadd.f32 %v108_v53, %v107_v50  ;;  %v103_v59 = vrot.slane %v102_v55, 2 }
  0x31   :  { %v95_v56 = vadd.f32 %v94_v52, %v93_v48  ;;  %v89_v58 = vrot.slane %v88_v54, 2 }
  0x32   :  { %v110_v61 = vrot.slane %v109_v57, 2  ;;  %v104_v63 = vadd.f32 %v103_v59, %v102_v55 }
  0x33   :  { %v96_v60 = vrot.slane %v95_v56, 2  ;;  %v90_v62 = vadd.f32 %v89_v58, %v88_v54 }
  0x34   :  { %v111_v1 = vadd.f32 %v110_v61, %v109_v57  ;;  %v105_v3 = vrot.slane %v104_v63, 1 }
  0x35   :  { %v97_v0 = vadd.f32 %v96_v60, %v95_v56  ;;  %v91_v2 = vrot.slane %v90_v62, 1 }
  0x36   :  { %v112_v5 = vrot.slane %v111_v1, 1  ;;  %v106_v7 = vadd.f32 %v105_v3, %v104_v63 }
  0x37   :  { %v98_v4 = vrot.slane %v97_v0, 1  ;;  %v92_v6 = vadd.f32 %v91_v2, %v90_v62 }
  0x38   :  { %v113_v9 = vadd.f32 %v112_v5, %v111_v1  ;;  %v116_v11 = vmul.f32 0.25, %v106_v7 }
  0x39   :  { %v99_v8 = vadd.f32 %v98_v4, %v97_v0  ;;  %v114_v10 = vmul.f32 0.25, %v92_v6 }
  0x3a   :  { %v117_v13 = vmul.f32 0.25, %v113_v9  ;;  %v120_v15 = vadd.f32 1e-05, %v116_v11 }
  0x3b   :  { %v115_v12 = vmul.f32 0.25, %v99_v8  ;;  %v118_v14 = vadd.f32 1e-05, %v114_v10 }
  0x3c   :  { %v121_v17 = vadd.f32 1e-05, %v117_v13 }
  0x3d   :  { %v119_v16 = vadd.f32 1e-05, %v115_v12  ;;  %179 = vrsqrt.f32 %v118_v14 }
  0x3e   :  { %181 = vrsqrt.f32 %v120_v15 }
  0x3f   :  { %183 = vrsqrt.f32 %v119_v16 }
  0x40   :  { %185 = vrsqrt.f32 %v121_v17 }
  0x47   :  { %v180_v18 = vpop.eup %179 }
  0x48   :  { %v182_v22 = vpop.eup %181 }
  0x49   :  { %v184_v23 = vpop.eup %183 }
  0x4a   :  { %v186_v24 = vpop.eup %185  ;;  %v131_v27 = vcombine.low %v180_v18, %v184_v23 }
  0x4b   :  { %v132_v28 = vcombine.low %v182_v22, %v186_v24 }
  0x4c   :  { %v135_v30 = vmul.f32 %v131_v27, %v76_v40 }
  0x4d   :  { %v136_v31 = vmul.f32 %v132_v28, %v77_v41 }
  0x94   :  { %v140_v32 = vpop.permute.xlu0 %139 }
  0x95   :  { %v147_v33 = vrot.slane %v140_v32, %v146_v29 }
  0x97   :  { %v149_v34 = vmul.f32 %v147_v33, %v135_v30  ;;  %v150_v35 = vmul.f32 %v147_v33, %v136_v31 }
  0x99   :  { %151 = vst [vmem:[#allocation5] sm:$0xff] %v149_v34  ;;  %152 = vst [vmem:[#allocation5 + $0x8] sm:$0xff] %v150_v35 }
  0x9a   :  { %220 = shalt.err (!%p217_p12)
}
  0x9b   :  { %s221_s28 = scalar_lea.hbm %s299_s2, 256 }
  0x9c   :  { %p222_p13 = scmp.ne.s32.totalorder %s299_s2, %s221_s28  ;;  %p225_p0 = scmp.lt.u32.totalorder %s221_s28, %s299_s2 }
  0x9e   :  { %p227_p1 = pnand %p225_p0, %p222_p13 }
  0xa0   :  { %230 = shalt.err (!%p227_p1)
}
  0xa1   :  { %164 = dma.vmem_to_hbm [thread:$0]  %s159_s1, 256, %s299_s2, [#allocation4], %s236_s19, %s236_s19, %s237_s20  }
  0xa2   :  { %233 = dma.done.wait [#allocation4], 256  }
  0xa3   :  { %234 = vsyncadd [#allocation4], 4294967040 }
  0xa4   :  { %168 = vsyncpa [#allocation3], 1 }
  0xa5   :  { %169 = vsyncpa [#allocation4], 1 }

</bundles_post_ra>
